<compile_context>
chip_gen: v7x
topology: tpu7x:2x2x1
jax: 0.10.0
libtpu: 0.0.40
codegen_flags: <defaults>
</compile_context>

<pallas_src>
import jax
import jax.numpy as jnp
from jax.experimental import pallas as pl
from jax.experimental.pallas import tpu as pltpu


NUM_UNITS = 10  # default `num_units` of NNModel


def _round_up(n, m):
    return ((n + m - 1) // m) * m


def _pick_batch_tile(batch, tile_b):
    """Batch-tile width (lanes): multiple of 128, big enough to amortize the
    per-grid-step overhead, and >= 2 grid steps once the batch is large enough
    so v7x's two TensorCores both get work."""
    assert tile_b >= 128 and tile_b % 128 == 0, "tile_b must be a multiple of 128"
    if batch > tile_b:
        return tile_b                              # >= 2 grid steps automatically
    if batch > 2048:
        return _round_up(-(-batch // 2), 128)      # split into 2 steps (v7x 2 TCs)
    return _round_up(batch, 128)                   # single lane-dense tile


def _mlp_kernel(xt_ref, w0_ref, b0_ref, w1_ref, b1_ref, w2_ref, b2_ref, o_ref):
    # xt tile: (20, TILE_B), lane-dense.  All activations stay (features, TILE_B).
    x = xt_ref[...]

    # Layer 0: (U, 20) @ (20, TILE_B) -> (U, TILE_B) on the MXU (native orientation).
    h0 = jnp.dot(w0_ref[...], x, preferred_element_type=jnp.float32)
    h0 = jnp.maximum(h0 + b0_ref[...], 0.0)

    # Layer 1: (10, U) @ (U, TILE_B) -> (10, TILE_B) on the MXU.
    h1 = jnp.dot(w1_ref[...], h0, preferred_element_type=jnp.float32)
    h1 = jnp.maximum(h1 + b1_ref[...], 0.0)

    # Output layer on the VPU/XLU: broadcast-multiply by the (10, 1) weight
    # column and reduce over the feature sublanes -> lane-dense (1, TILE_B).
    out = jnp.sum(w2_ref[...] * h1, axis=0, keepdims=True) + b2_ref[0]
    o_ref[...] = out.astype(o_ref.dtype)


def nn_model_forward(x, params, *, tile_b=8192):
    """Fused MLP forward pass as a single batch-tiled Pallas kernel.

    x: (batch, 20) float32.  Returns (batch, 1) float32.
    params: weights in PyTorch-native (out_features, in_features) layout,
    biases as (out_features,) vectors.
    """
    w0, b0, w1, b1, w2, b2 = params
    batch, in_feat = x.shape
    num_units = w0.shape[0]

    tb = _pick_batch_tile(batch, tile_b)
    padded = _round_up(batch, tb)
    num_tiles = padded // tb

    # Feature-major view of x with the tail pad folded into the same copy
    # (one small producer-side op; no separate full-array pad pass).
    x_t = x.T
    if padded != batch:
        x_t = jnp.pad(x_t, ((0, 0), (0, padded - batch)))

    # Tiny parameter reshapes (resident tensors, negligible cost).
    b0c = b0.reshape(num_units, 1)
    b1c = b1.reshape(10, 1)
    w2c = w2.reshape(10, 1)        # (1, 10) weight row -> column for the VPU layer
    b2s = b2.reshape(1)            # SMEM scalar

    const = lambda i: (0, 0)       # weights/biases: DMA'd once, stay resident

    out_t = pl.pallas_call(
        _mlp_kernel,
        out_shape=jax.ShapeDtypeStruct((1, padded), jnp.float32),
        grid=(num_tiles,),
        in_specs=[
            pl.BlockSpec((in_feat, tb), lambda i: (0, i)),      # x^T, streamed lane-dense
            pl.BlockSpec((num_units, in_feat), const),          # W0
            pl.BlockSpec((num_units, 1), const),                # b0
            pl.BlockSpec((10, num_units), const),               # W1
            pl.BlockSpec((10, 1), const),                       # b1
            pl.BlockSpec((10, 1), const),                       # W2 column
            pl.BlockSpec(memory_space=pltpu.MemorySpace.SMEM),  # b2 scalar
        ],
        out_specs=pl.BlockSpec((1, tb), lambda i: (0, i)),      # lane-dense output
        compiler_params=pltpu.CompilerParams(
            dimension_semantics=("parallel",)),
    )(x_t, w0, b0c, w1, b1c, w2c, b2s)

    # (1, padded) -> (padded, 1) is a layout-free reshape; drop the pad tail.
    return out_t.reshape(padded, 1)[:batch]


def init_params(key, num_units=NUM_UNITS):
    """PyTorch-style init: U(-1/sqrt(fan_in), 1/sqrt(fan_in)).

    Weights stored as (out_features, in_features); biases as (out_features,).
    """
    def linear_init(key, fan_in, fan_out):
        kw, kb = jax.random.split(key)
        bound = 1.0 / jnp.sqrt(float(fan_in))
        w = jax.random.uniform(kw, (fan_out, fan_in), jnp.float32, -bound, bound)
        b = jax.random.uniform(kb, (fan_out,), jnp.float32, -bound, bound)
        return w, b

    k0, k1, k2 = jax.random.split(key, 3)
    w0, b0 = linear_init(k0, 20, num_units)      # dense0: Linear(20, num_units)
    w1, b1 = linear_init(k1, num_units, 10)      # dense1: Linear(num_units, 10)
    w2, b2 = linear_init(k2, 10, 1)              # output: Linear(10, 1)
    return (w0, b0, w1, b1, w2, b2)


def reference_forward(x, params):
    """Plain-JAX reference matching the PyTorch forward."""
    w0, b0, w1, b1, w2, b2 = params
    h0 = jnp.maximum(x @ w0.T + b0, 0.0)
    h1 = jnp.maximum(h0 @ w1.T + b1, 0.0)
    return h1 @ w2.T + b2


if __name__ == "__main__":
    key = jax.random.PRNGKey(0)
    k_params, k_x1, k_x2 = jax.random.split(key, 3)

    params = init_params(k_params, NUM_UNITS)

    # Small batch: single 128-wide lane-dense tile (unmasked stores).
    x_small = jax.random.normal(k_x1, (8, 20), dtype=jnp.float32)
    out_small = jax.block_until_ready(nn_model_forward(x_small, params))
    ref_small = reference_forward(x_small, params)
    assert out_small.shape == (8, 1), out_small.shape
    assert jnp.allclose(out_small, ref_small, atol=1e-4, rtol=1e-2), "small-batch mismatch"

    # Ragged batch with a small tile_b override: exercises the multi-tile grid,
    # pipelining, tail padding, and the lane-dense output path.
    x_big = jax.random.normal(k_x2, (700, 20), dtype=jnp.float32)
    out_big = jax.block_until_ready(nn_model_forward(x_big, params, tile_b=256))
    ref_big = reference_forward(x_big, params)
    assert out_big.shape == (700, 1), out_big.shape
    assert jnp.allclose(out_big, ref_big, atol=1e-4, rtol=1e-2), "multi-tile mismatch"

    # Same batch at the default (large) tile size: single-tile fast path.
    out_def = jax.block_until_ready(nn_model_forward(x_big, params))
    assert jnp.allclose(out_def, ref_big, atol=1e-4, rtol=1e-2), "default-tile mismatch"

    print("KERNEL_OK")
</pallas_src>

<mosaic_0001>
module attributes {stable_mosaic.version = 11 : i64} {
  func.func @_mlp_kernel(%arg0: i32, %arg1: memref<20x128xf32, #tpu.memory_space<vmem>>, %arg2: memref<10x20xf32, #tpu.memory_space<vmem>>, %arg3: memref<10x1xf32, #tpu.memory_space<vmem>>, %arg4: memref<10x10xf32, #tpu.memory_space<vmem>>, %arg5: memref<10x1xf32, #tpu.memory_space<vmem>>, %arg6: memref<10x1xf32, #tpu.memory_space<vmem>>, %arg7: memref<1xf32, #tpu.memory_space<smem>>, %arg8: memref<1x128xf32, #tpu.memory_space<vmem>>) attributes {dimension_semantics = [#tpu.dimension_semantics<parallel>], iteration_bounds = array<i64: 1>, scalar_prefetch = 0 : i64, scratch_operands = 0 : i64, tpu.core_type = #tpu.core_type<tc>, window_params = [{transform_indices = @transform_0, window_bounds = array<i64: 20, 128>}, {pipeline_mode = #tpu.pipeline_mode<synchronous>, transform_indices = @transform_1, window_bounds = array<i64: 10, 20>}, {pipeline_mode = #tpu.pipeline_mode<synchronous>, transform_indices = @transform_2, window_bounds = array<i64: 10, 1>}, {pipeline_mode = #tpu.pipeline_mode<synchronous>, transform_indices = @transform_3, window_bounds = array<i64: 10, 10>}, {pipeline_mode = #tpu.pipeline_mode<synchronous>, transform_indices = @transform_4, window_bounds = array<i64: 10, 1>}, {pipeline_mode = #tpu.pipeline_mode<synchronous>, transform_indices = @transform_5, window_bounds = array<i64: 10, 1>}, {transform_indices = @transform_6, window_bounds = array<i64: 1>}, {transform_indices = @transform_7, window_bounds = array<i64: 1, 128>}]} {
    %c0 = arith.constant 0 : index
    %c0_0 = arith.constant 0 : index
    %0 = vector.load %arg1[%c0, %c0_0] : memref<20x128xf32, #tpu.memory_space<vmem>>, vector<20x128xf32>
    %c0_1 = arith.constant 0 : index
    %c0_2 = arith.constant 0 : index
    %1 = vector.load %arg2[%c0_1, %c0_2] : memref<10x20xf32, #tpu.memory_space<vmem>>, vector<10x20xf32>
    %cst = arith.constant dense<0.000000e+00> : vector<10x128xf32>
    %2 = tpu.matmul %1, %0, %cst {dimension_numbers = #tpu.dot_dimension_numbers<[1], [0], [0], [1], [0, 0, 1, 1], [], []>} : vector<10x20xf32>, vector<20x128xf32>, vector<10x128xf32> -> vector<10x128xf32>
    %c0_3 = arith.constant 0 : index
    %c0_4 = arith.constant 0 : index
    %3 = vector.load %arg3[%c0_3, %c0_4] : memref<10x1xf32, #tpu.memory_space<vmem>>, vector<10x1xf32>
    %4 = vector.broadcast %3 : vector<10x1xf32> to vector<10x128xf32>
    %5 = arith.addf %2, %4 : vector<10x128xf32>
    %cst_5 = arith.constant 0.000000e+00 : f32
    %6 = vector.broadcast %cst_5 : f32 to vector<10x128xf32>
    %7 = arith.maximumf %5, %6 : vector<10x128xf32>
    %c0_6 = arith.constant 0 : index
    %c0_7 = arith.constant 0 : index
    %8 = vector.load %arg4[%c0_6, %c0_7] : memref<10x10xf32, #tpu.memory_space<vmem>>, vector<10x10xf32>
    %cst_8 = arith.constant dense<0.000000e+00> : vector<10x128xf32>
    %9 = tpu.matmul %8, %7, %cst_8 {dimension_numbers = #tpu.dot_dimension_numbers<[1], [0], [0], [1], [0, 0, 1, 1], [], []>} : vector<10x10xf32>, vector<10x128xf32>, vector<10x128xf32> -> vector<10x128xf32>
    %c0_9 = arith.constant 0 : index
    %c0_10 = arith.constant 0 : index
    %10 = vector.load %arg5[%c0_9, %c0_10] : memref<10x1xf32, #tpu.memory_space<vmem>>, vector<10x1xf32>
    %11 = vector.broadcast %10 : vector<10x1xf32> to vector<10x128xf32>
    %12 = arith.addf %9, %11 : vector<10x128xf32>
    %cst_11 = arith.constant 0.000000e+00 : f32
    %13 = vector.broadcast %cst_11 : f32 to vector<10x128xf32>
    %14 = arith.maximumf %12, %13 : vector<10x128xf32>
    %c0_12 = arith.constant 0 : index
    %c0_13 = arith.constant 0 : index
    %15 = vector.load %arg6[%c0_12, %c0_13] : memref<10x1xf32, #tpu.memory_space<vmem>>, vector<10x1xf32>
    %16 = vector.broadcast %15 : vector<10x1xf32> to vector<10x128xf32>
    %17 = arith.mulf %16, %14 : vector<10x128xf32>
    %cst_14 = arith.constant dense<0.000000e+00> : vector<128xf32>
    %18 = vector.multi_reduction <add>, %17, %cst_14 [0] : vector<10x128xf32> to vector<128xf32>
    %19 = vector.shape_cast %18 : vector<128xf32> to vector<1x128xf32>
    %c0_15 = arith.constant 0 : index
    %20 = memref.load %arg7[%c0_15] : memref<1xf32, #tpu.memory_space<smem>>
    %21 = vector.broadcast %20 : f32 to vector<1x128xf32>
    %22 = arith.addf %19, %21 : vector<1x128xf32>
    %c0_16 = arith.constant 0 : index
    %c0_17 = arith.constant 0 : index
    %23 = vector.load %arg8[%c0_16, %c0_17] : memref<1x128xf32, #tpu.memory_space<vmem>>, vector<1x128xf32>
    tpu.vector_store %arg8[%c0_16, %c0_17], %22 {strides = array<i32>} : memref<1x128xf32, #tpu.memory_space<vmem>>, vector<1x128xf32>,
    return
  }
  func.func @transform_0(%arg0: i32) -> (i32, i32) {
    %c0_i32 = arith.constant 0 : i32
    %c0_i32_0 = arith.constant 0 : i32
    return %c0_i32, %arg0 : i32, i32
  }
  func.func @transform_1(%arg0: i32) -> (i32, i32) {
    %c0_i32 = arith.constant 0 : i32
    %c0_i32_0 = arith.constant 0 : i32
    %c0_i32_1 = arith.constant 0 : i32
    return %c0_i32, %c0_i32_0 : i32, i32
  }
  func.func @transform_2(%arg0: i32) -> (i32, i32) {
    %c0_i32 = arith.constant 0 : i32
    %c0_i32_0 = arith.constant 0 : i32
    %c0_i32_1 = arith.constant 0 : i32
    return %c0_i32, %c0_i32_0 : i32, i32
  }
  func.func @transform_3(%arg0: i32) -> (i32, i32) {
    %c0_i32 = arith.constant 0 : i32
    %c0_i32_0 = arith.constant 0 : i32
    %c0_i32_1 = arith.constant 0 : i32
    return %c0_i32, %c0_i32_0 : i32, i32
  }
  func.func @transform_4(%arg0: i32) -> (i32, i32) {
    %c0_i32 = arith.constant 0 : i32
    %c0_i32_0 = arith.constant 0 : i32
    %c0_i32_1 = arith.constant 0 : i32
    return %c0_i32, %c0_i32_0 : i32, i32
  }
  func.func @transform_5(%arg0: i32) -> (i32, i32) {
    %c0_i32 = arith.constant 0 : i32
    %c0_i32_0 = arith.constant 0 : i32
    %c0_i32_1 = arith.constant 0 : i32
    return %c0_i32, %c0_i32_0 : i32, i32
  }
  func.func @transform_6(%arg0: i32) -> i32 {
    %c0_i32 = arith.constant 0 : i32
    %c0_i32_0 = arith.constant 0 : i32
    return %c0_i32 : i32
  }
  func.func @transform_7(%arg0: i32) -> (i32, i32) {
    %c0_i32 = arith.constant 0 : i32
    %c0_i32_0 = arith.constant 0 : i32
    return %c0_i32, %arg0 : i32, i32
  }
}

</mosaic_0001>

<bundles_post_ra>
// kernel: tpu_custom_call.1
= control target key start
LH: loop header
LB: loop body
LE: loop exit
PB: predicated region body
PF: predicated region fallthrough
CT: control target
= control target key end

     0   :  { %vm45_vm0 = vcmask 162816   ;;  %vm52_vm1 = vcmask 1043456   ;;  %v345_v6 = vmov 0   ;;  %s448_s0 = inlined_call_operand.vmem [shape: f32[20,128], index: 0, kind: input, shape index: {}]   ;;  %s449_s1 = inlined_call_operand.vmem [shape: f32[10,20], index: 1, kind: input, shape index: {}]   ;;  %s450_s2 = inlined_call_operand.vmem [shape: f32[10,1], index: 2, kind: input, shape index: {}]   ;;  %s451_s3 = inlined_call_operand.vmem [shape: f32[10,10], index: 3, kind: input, shape index: {}]   ;;  %s452_s4 = inlined_call_operand.vmem [shape: f32[10,1], index: 4, kind: input, shape index: {}]   ;;  %s453_s5 = inlined_call_operand.vmem [shape: f32[10,1], index: 5, kind: input, shape index: {}]   ;;  %s454_s6 = inlined_call_operand.<no memory space> [shape: f32[1], index: 6, kind: input, shape index: {}]   ;;  %s455_s7 = inlined_call_operand.hbm [shape: f32[1,128], index: 7, kind: output, shape index: {}]  }
   0x1   :  { %v28_v0 = vld [vmem:[%s448_s0] sm:$0xff]  ;;  %v29_v1 = vld [vmem:[%s448_s0 + $0x8] sm:$0xff]  ;;  %v30_v5 = vld [vmem:[%s448_s0 + $0x10] sm:$0xf]  ;;  %319 = vset.pattern.permute.xlu0 %v345_v6 }
   0x2   :  { %v306_v2 = vpack.c.bf16 %v29_v1, %v28_v0  ;;  %v31_v3 = vld [vmem:[%s449_s1] sm:$0xff] }
   0x3   :  { %v33_v4 = vld [vmem:[%s450_s2] sm:$0xff]  ;;  %296 = vmatprep.mubr.msk.f32.mxu0 %vm45_vm0, %v31_v3 }
   0x4   :  { %13 = vsyncpa [#allocation4], 0  ;;  %307 = vmatprep.subr.bf16.mxu0 %v306_v2  ;;  %37 = vperm.xlu0 %319, %v33_v4   ;;  %v34_v7 = vld [vmem:[%s450_s2 + $0x8] sm:$0x3]  ;;  %v133_v10 = vld [vmem:[%s451_s3] sm:$0xff]  ;;  %vm147_vm2 = vcmask 80896   ;;  %v258_v43 = vstv %s454_s6 }
   0x5   :  { %309 = vmatpush3.bf16.msra.mxu0 %v306_v2  ;;  %320 = vset.pattern.permute.xlu1 %v345_v6  ;;  %v32_v8 = vld [vmem:[%s449_s1 + $0x8] sm:$0x3]  ;;  %v135_v12 = vld [vmem:[%s452_s4] sm:$0xff]  ;;  %vm154_vm3 = vcmask 1041408   ;;  %vm346_vm4 = vmmov 1   ;;  %s347_s23 = smov [#allocation3]  }
   0x6   :  { %294 = vmatprep.subr.msk.mxu0 %vm52_vm1, %v30_v5  ;;  %v236_v9 = vld [vmem:[%s453_s5 + $0x8] sm:$0x3]  ;;  %303 = vmatprep.mubr.msk.f32.mxu1 %vm147_vm2, %v133_v10  ;;  %v235_v13 = vld [vmem:[%s453_s5] sm:$0xff]  ;;  %vm311_vm5 = vmpackc.low %vm154_vm3, %vm346_vm4  ;;  %s267_s24 = sshll.u32 %s347_s23, 4  ;;  %s268_s24 = int_to_ptr.vmem [resolvable:$true] %s267_s24 }
   0x7   :  { %v136_v11 = vld [vmem:[%s452_s4 + $0x8] sm:$0x3]  ;;  %s321_s25 = scalar_lea.vmem %s268_s24, 16  ;;  %s325_s26 = scalar_lea.vmem %s268_s24, 32 }
   0x8   :  { %42 = vperm.xlu0 %319, %v34_v7   ;;  %144 = vperm.xlu1 %320, %v136_v11   ;;  %v134_v23 = vld [vmem:[%s451_s3 + $0x8] sm:$0x3]  ;;  %p322_p0 = scmp.ne.s32.totalorder %s268_s24, %s321_s25  ;;  %p326_p1 = scmp.lt.s32.totalorder %s268_s24, %s268_s24 }
   0x9   :  { %295 = vmatpush3.msk.msra.mxu0 %vm52_vm1, %v30_v5  ;;  %p327_p2 = scmp.lt.s32.totalorder %s325_s26, %s321_s25 }
   0xa   :  { %297 = vmatmul.mubr.msk.f32.vlgmr.msra.gmra.mrb[0].mxu0 %vm45_vm0, %v32_v8 }
   0xb   :  { %p328_p3 = por %p327_p2, %p326_p1 }
   0xc   :  { %244 = vperm.xlu0 %319, %v236_v9   ;;  %139 = vperm.xlu1 %320, %v135_v12  }
   0xd   :  { %p329_p4 = pnand %p328_p3, %p322_p0 }
  0x10   :  { %239 = vperm.xlu1 %320, %v235_v13  }
  0x83   :  { %v38_v14 = vpop.permute.xlu0 %37 }
  0x87   :  { %v43_v15 = vpop.permute.xlu0 %42  ;;  %v145_v24 = vpop.permute.xlu1 %144 }
  0x8b   :  { %v140_v25 = vpop.permute.xlu1 %139  ;;  %v245_v31 = vpop.permute.xlu0 %244 }
  0x8f   :  { %v240_v33 = vpop.permute.xlu1 %239 }
  0xdd   :  { %v298_v16 = vpop.f32.mrb[0].mxu0 }
  0xde   :  { %v128_v17 = vadd.f32 %v298_v16, %v43_v15  ;;  %v122_v18 = vpop.f32.mrb[1].mxu0 }
  0xdf   :  { %v123_v19 = vadd.f32 %v122_v18, %v38_v14 }
  0xe0   :  { %v132_v20 = vmax.f32 %v128_v17, 0.0 }
  0xe1   :  { %v131_v21 = vmax.f32 %v123_v19, 0.0 }
  0xe3   :  { %v310_v22 = vpack.c.bf16 %v132_v20, %v131_v21 }
  0xe5   :  { %312 = vmatprep.subr.msk.bf16.mxu1 %vm311_vm5, %v310_v22 }
  0xe6   :  { %315 = vmatpush3.bf16.msk.msra.mxu1 %vm311_vm5, %v310_v22 }
  0xe9   :  { %304 = vmatmul.mubr.msk.f32.vlgmr.msra.gmra.mrb[0].mxu1 %vm147_vm2, %v134_v23 }
 0x1bc   :  { %v305_v26 = vpop.f32.mrb[0].mxu1 }
 0x1bd   :  { %v230_v27 = vadd.f32 %v305_v26, %v145_v24  ;;  %v224_v28 = vpop.f32.mrb[1].mxu1 }
 0x1be   :  { %v225_v29 = vadd.f32 %v224_v28, %v140_v25 }
 0x1bf   :  { %v234_v30 = vmax.f32 %v230_v27, 0.0 }
 0x1c0   :  { %v233_v32 = vmax.f32 %v225_v29, 0.0 }
 0x1c1   :  { %v248_v34 = vmul.f32 %v245_v31, %v234_v30 }
 0x1c2   :  { %v247_v35 = vmul.f32 %v240_v33, %v233_v32 }
 0x1c3   :  { %v249_v36 = vsel %vm154_vm3, %v248_v34, 0.0 }
 0x1c4   :  { %v250_v37 = vadd.f32 %v249_v36, %v247_v35 }
 0x1c6   :  { %v251_v38 = vrot.slane %v250_v37, 4 }
 0x1c8   :  { %v252_v39 = vadd.f32 %v251_v38, %v250_v37 }
 0x1ca   :  { %v253_v40 = vrot.slane %v252_v39, 2 }
 0x1cc   :  { %v254_v41 = vadd.f32 %v253_v40, %v252_v39 }
 0x1ce   :  { %v255_v42 = vrot.slane %v254_v41, 1 }
 0x1d0   :  { %v256_v44 = vadd.f32 %v255_v42, %v254_v41 }
 0x1d2   :  { %v259_v45 = vadd.f32 %v258_v43, %v256_v44 }
 0x1d4   :  { %260 = vst [vmem:[#allocation3] sm:$0x1] %v259_v45 }
 0x1d5   :  { %332 = shalt.err (!%p329_p4)
}
 0x1d6   :  { %s333_s29 = scalar_lea.hbm %s455_s7, 16 }
 0x1d7   :  { %p334_p5 = scmp.ne.s32.totalorder %s455_s7, %s333_s29  ;;  %p337_p6 = scmp.lt.u32.totalorder %s333_s29, %s455_s7 }
 0x1d9   :  { %p339_p7 = pnand %p337_p6, %p334_p5 }
 0x1db   :  { %342 = shalt.err (!%p339_p7)
}
 0x1dc   :  { %270 = dma.vmem_to_hbm [thread:$0]  %s268_s24, 16, %s455_s7, [#allocation4]  }
 0x1dd   :  { %343 = dma.done.wait [#allocation4], 16  }
 0x1de   :  { %344 = vsyncadd [#allocation4], 4294967280 }
 0x1df   :  { %274 = vsyncpa [#allocation4], 1 }

</bundles_post_ra>
